<compile_context>
chip_gen: v6e
topology: v6e:2x2x1
jax: 0.10.0
libtpu: 0.0.40
codegen_flags: <defaults>
</compile_context>

<pallas_src>
import jax
import jax.numpy as jnp
from jax import lax
from jax.experimental import pallas as pl
from jax.experimental.pallas import tpu as pltpu


def _mha_kernel(x_ref, wq_ref, wk_ref, wv_ref, wo_ref, cos_ref, sin_ref, o_ref):
    """Grid = (batch, head). One (batch b, head h) tile per step; all refs are VMEM tiles."""
    x = x_ref[0]            # [S, D]   bf16 (resident across the head axis)
    wq = wq_ref[0]          # [D, hd]  bf16 (columns pre-permuted to split RoPE layout)
    wk = wk_ref[0]          # [D, hd]  bf16 (pre-permuted)
    wv = wv_ref[0]          # [D, hd]  bf16
    wo = wo_ref[0]          # [hd, D]  bf16 (this head's row block of the out projection)
    cos = cos_ref[...]      # [S, hd]  f32  (cos duplicated over both halves)
    sin = sin_ref[...]      # [S, hd]  f32  ([-sin | +sin], pair sign folded in on the host)

    S, hd = cos.shape
    scaling = hd ** -0.5

    # Q/K/V projections for this head (MXU, bf16 x bf16 -> f32 accumulation).
    q = jnp.dot(x, wq, preferred_element_type=jnp.float32)    # [S, hd]
    k = jnp.dot(x, wk, preferred_element_type=jnp.float32)    # [S, hd]
    v = jnp.dot(x, wv, preferred_element_type=jnp.float32)    # [S, hd]

    # Rotary embedding in split layout: x*cos + half_swap(x)*sin_signed (XLU roll + VPU, f32).
    q = q * cos + pltpu.roll(q, hd // 2, 1) * sin
    k = k * cos + pltpu.roll(k, hd // 2, 1) * sin
    q = q * scaling

    # Scores [S, S] in f32; contraction over hd without an explicit k.T (NT dimension numbers).
    s = lax.dot_general(
        q.astype(jnp.bfloat16), k.astype(jnp.bfloat16),
        dimension_numbers=(((1,), (1,)), ((), ())),
        preferred_element_type=jnp.float32)

    # Causal additive mask generated in-kernel (cheap iota + select, no HBM mask tensor).
    row = lax.broadcasted_iota(jnp.int32, (S, S), 0)
    col = lax.broadcasted_iota(jnp.int32, (S, S), 1)
    s = s + jnp.where(col > row, jnp.float32(-1e9), jnp.float32(0.0))
    # TODO(synk): arbitrary user-supplied additive attention_mask would need an extra input.

    # Softmax in f32 (v5e has no bf16 VPU/EUP); denominator reciprocal on the EUP.
    s = s - jnp.max(s, axis=-1, keepdims=True)
    e = jnp.exp(s)
    p = e * pl.reciprocal(jnp.sum(e, axis=-1, keepdims=True), approx=True)
    # TODO(synk): attention-probability dropout (training mode) not implemented.

    ctx = jnp.dot(p.astype(jnp.bfloat16), v.astype(jnp.bfloat16),
                  preferred_element_type=jnp.float32)          # [S, hd]
    contrib = jnp.dot(ctx.astype(jnp.bfloat16), wo,
                      preferred_element_type=jnp.float32)      # [S, D], lane-dense

    # Accumulate head contributions directly into the resident f32 output block (no scratch).
    @pl.when(pl.program_id(1) == 0)
    def _():
        o_ref[...] = jnp.zeros_like(o_ref)

    o_ref[0] += contrib


def multi_head_attention(hidden_states, wq, wk, wv, wo, cos_half, sin_half, num_heads):
    """hidden_states: [B, S, D] f32. w*: [D, D] f32 stored as [in, out] (y = x @ W, == PyTorch x @ W.T).
    cos_half / sin_half: [S, head_dim // 2] f32 precomputed rotary frequencies. Causal attention."""
    B, S, D = hidden_states.shape
    nh = num_heads
    hd = D // nh
    assert hd % 2 == 0, "head_dim must be even for rotary embeddings"

    # --- host-side layout plumbing (one-time, negligible) ---
    # Interleaved -> split column permutation within each head for the Q/K weights.
    perm = jnp.concatenate([jnp.arange(0, hd, 2), jnp.arange(1, hd, 2)])
    wq3 = jnp.transpose(wq.reshape(D, nh, hd)[:, :, perm], (1, 0, 2)).astype(jnp.bfloat16)  # [nh, D, hd]
    wk3 = jnp.transpose(wk.reshape(D, nh, hd)[:, :, perm], (1, 0, 2)).astype(jnp.bfloat16)  # [nh, D, hd]
    wv3 = jnp.transpose(wv.reshape(D, nh, hd), (1, 0, 2)).astype(jnp.bfloat16)              # [nh, D, hd]
    wo3 = wo.reshape(nh, hd, D).astype(jnp.bfloat16)                                        # [nh, hd, D]
    x_bf = hidden_states.astype(jnp.bfloat16)

    # cos duplicated over both halves; pair sign folded into sin so the kernel needs no sign mask.
    cos_cat = jnp.concatenate([cos_half, cos_half], axis=-1).astype(jnp.float32)   # [S, hd]
    sin_rot = jnp.concatenate([-sin_half, sin_half], axis=-1).astype(jnp.float32)  # [S, hd]

    cost = pl.CostEstimate(
        flops=int(B * (8 * S * D * D + 4 * S * S * D)),
        transcendentals=int(B * nh * S * S),
        bytes_accessed=int(B * S * D * 2 + 4 * D * D * 2 + 2 * S * hd * 4 + B * S * D * 4),
    )

    return pl.pallas_call(
        _mha_kernel,
        out_shape=jax.ShapeDtypeStruct((B, S, D), jnp.float32),
        grid=(B, nh),  # batch parallel; head is a reduction into the resident output block
        in_specs=[
            pl.BlockSpec((1, S, D), lambda b, h: (b, 0, 0)),    # x (invariant over heads)
            pl.BlockSpec((1, D, hd), lambda b, h: (h, 0, 0)),   # wq, per-head block
            pl.BlockSpec((1, D, hd), lambda b, h: (h, 0, 0)),   # wk
            pl.BlockSpec((1, D, hd), lambda b, h: (h, 0, 0)),   # wv
            pl.BlockSpec((1, hd, D), lambda b, h: (h, 0, 0)),   # wo row block
            pl.BlockSpec((S, hd), lambda b, h: (0, 0)),         # cos
            pl.BlockSpec((S, hd), lambda b, h: (0, 0)),         # sin (sign-folded)
        ],
        out_specs=pl.BlockSpec((1, S, D), lambda b, h: (b, 0, 0)),
        compiler_params=pltpu.CompilerParams(
            dimension_semantics=("parallel", "arbitrary")),
        cost_estimate=cost,
    )(x_bf, wq3, wk3, wv3, wo3, cos_cat, sin_rot)


# ---------------- reference (pure JAX f32, mirrors the PyTorch module) ----------------
def _ref_rope(x, cos_half, sin_half, nh):
    B, S, D = x.shape
    hd = D // nh
    xr = x.reshape(B, S, nh, hd // 2, 2)
    a, b = xr[..., 0], xr[..., 1]
    c = cos_half[None, :, None, :]
    s = sin_half[None, :, None, :]
    out = jnp.stack([a * c - b * s, a * s + b * c], axis=-1)
    return out.reshape(B, S, D)


def _ref_forward(x, wq, wk, wv, wo, cos_half, sin_half, nh):
    B, S, D = x.shape
    hd = D // nh
    q = x @ wq
    k = x @ wk
    v = x @ wv
    q = _ref_rope(q, cos_half, sin_half, nh)
    k = _ref_rope(k, cos_half, sin_half, nh)
    q = q.reshape(B, S, nh, hd).transpose(0, 2, 1, 3)
    k = k.reshape(B, S, nh, hd).transpose(0, 2, 1, 3)
    v = v.reshape(B, S, nh, hd).transpose(0, 2, 1, 3)
    causal = jnp.tril(jnp.ones((S, S), jnp.bool_))
    bias = jnp.where(causal, 0.0, -1e9).astype(jnp.float32)
    s = jnp.einsum('bhqd,bhkd->bhqk', q, k) * (hd ** -0.5) + bias[None, None]
    p = jax.nn.softmax(s, axis=-1)
    o = jnp.einsum('bhqk,bhkd->bhqd', p, v).transpose(0, 2, 1, 3).reshape(B, S, D)
    return o @ wo


if __name__ == "__main__":
    B, S, D, NH = 2, 8, 32, 4
    HD = D // NH

    key = jax.random.PRNGKey(0)
    kx, kq, kk, kv, ko = jax.random.split(key, 5)

    x = jax.random.normal(kx, (B, S, D), jnp.float32)
    wq = 0.02 * jax.random.normal(kq, (D, D), jnp.float32)
    wk = 0.02 * jax.random.normal(kk, (D, D), jnp.float32)
    wv = 0.02 * jax.random.normal(kv, (D, D), jnp.float32)
    wo = 0.02 * jax.random.normal(ko, (D, D), jnp.float32)

    # Precomputed rotary frequencies (theta = 10000), as cos/sin halves [S, HD//2].
    inv_freq = 1.0 / (10000.0 ** (jnp.arange(0, HD, 2, dtype=jnp.float32) / HD))
    angles = jnp.arange(S, dtype=jnp.float32)[:, None] * inv_freq[None, :]   # [S, HD//2]
    cos_half = jnp.cos(angles)
    sin_half = jnp.sin(angles)

    out = multi_head_attention(x, wq, wk, wv, wo, cos_half, sin_half, NH)
    out = jax.block_until_ready(out)

    ref = _ref_forward(x, wq, wk, wv, wo, cos_half, sin_half, NH)
    assert out.shape == (B, S, D)
    # bf16 MXU inputs (f32 accumulation) -> compare against the f32 reference with bf16-level tolerance.
    assert jnp.allclose(out, ref, atol=2e-2, rtol=2e-2), "mismatch vs reference"

    print("KERNEL_OK")
</pallas_src>

<mosaic_0001>
module attributes {stable_mosaic.version = 11 : i64} {
  func.func @_mha_kernel(%arg0: i32, %arg1: i32, %arg2: memref<1x8x32xbf16, #tpu.memory_space<vmem>>, %arg3: memref<1x32x8xbf16, #tpu.memory_space<vmem>>, %arg4: memref<1x32x8xbf16, #tpu.memory_space<vmem>>, %arg5: memref<1x32x8xbf16, #tpu.memory_space<vmem>>, %arg6: memref<1x8x32xbf16, #tpu.memory_space<vmem>>, %arg7: memref<8x8xf32, #tpu.memory_space<vmem>>, %arg8: memref<8x8xf32, #tpu.memory_space<vmem>>, %arg9: memref<1x8x32xf32, #tpu.memory_space<vmem>>) attributes {dimension_semantics = [#tpu.dimension_semantics<parallel>, #tpu.dimension_semantics<arbitrary>], iteration_bounds = array<i64: 2, 4>, scalar_prefetch = 0 : i64, scratch_operands = 0 : i64, tpu.core_type = #tpu.core_type<tc>, window_params = [{transform_indices = @transform_0, window_bounds = array<i64: 1, 8, 32>}, {transform_indices = @transform_1, window_bounds = array<i64: 1, 32, 8>}, {transform_indices = @transform_2, window_bounds = array<i64: 1, 32, 8>}, {transform_indices = @transform_3, window_bounds = array<i64: 1, 32, 8>}, {transform_indices = @transform_4, window_bounds = array<i64: 1, 8, 32>}, {pipeline_mode = #tpu.pipeline_mode<synchronous>, transform_indices = @transform_5, window_bounds = array<i64: 8, 8>}, {pipeline_mode = #tpu.pipeline_mode<synchronous>, transform_indices = @transform_6, window_bounds = array<i64: 8, 8>}, {transform_indices = @transform_7, window_bounds = array<i64: 1, 8, 32>}]} {
    %c0 = arith.constant 0 : index
    %c0_0 = arith.constant 0 : index
    %c0_1 = arith.constant 0 : index
    %0 = vector.load %arg2[%c0, %c0_0, %c0_1] : memref<1x8x32xbf16, #tpu.memory_space<vmem>>, vector<1x8x32xbf16>
    %1 = vector.shape_cast %0 : vector<1x8x32xbf16> to vector<8x32xbf16>
    %c0_2 = arith.constant 0 : index
    %c0_3 = arith.constant 0 : index
    %c0_4 = arith.constant 0 : index
    %2 = vector.load %arg3[%c0_2, %c0_3, %c0_4] : memref<1x32x8xbf16, #tpu.memory_space<vmem>>, vector<1x32x8xbf16>
    %3 = vector.shape_cast %2 : vector<1x32x8xbf16> to vector<32x8xbf16>
    %c0_5 = arith.constant 0 : index
    %c0_6 = arith.constant 0 : index
    %c0_7 = arith.constant 0 : index
    %4 = vector.load %arg4[%c0_5, %c0_6, %c0_7] : memref<1x32x8xbf16, #tpu.memory_space<vmem>>, vector<1x32x8xbf16>
    %5 = vector.shape_cast %4 : vector<1x32x8xbf16> to vector<32x8xbf16>
    %c0_8 = arith.constant 0 : index
    %c0_9 = arith.constant 0 : index
    %c0_10 = arith.constant 0 : index
    %6 = vector.load %arg5[%c0_8, %c0_9, %c0_10] : memref<1x32x8xbf16, #tpu.memory_space<vmem>>, vector<1x32x8xbf16>
    %7 = vector.shape_cast %6 : vector<1x32x8xbf16> to vector<32x8xbf16>
    %c0_11 = arith.constant 0 : index
    %c0_12 = arith.constant 0 : index
    %c0_13 = arith.constant 0 : index
    %8 = vector.load %arg6[%c0_11, %c0_12, %c0_13] : memref<1x8x32xbf16, #tpu.memory_space<vmem>>, vector<1x8x32xbf16>
    %9 = vector.shape_cast %8 : vector<1x8x32xbf16> to vector<8x32xbf16>
    %c0_14 = arith.constant 0 : index
    %c0_15 = arith.constant 0 : index
    %10 = vector.load %arg7[%c0_14, %c0_15] : memref<8x8xf32, #tpu.memory_space<vmem>>, vector<8x8xf32>
    %c0_16 = arith.constant 0 : index
    %c0_17 = arith.constant 0 : index
    %11 = vector.load %arg8[%c0_16, %c0_17] : memref<8x8xf32, #tpu.memory_space<vmem>>, vector<8x8xf32>
    %cst = arith.constant dense<0.000000e+00> : vector<8x8xf32>
    %12 = tpu.matmul %1, %3, %cst {dimension_numbers = #tpu.dot_dimension_numbers<[1], [0], [0], [1], [0, 0, 1, 1], [], []>} : vector<8x32xbf16>, vector<32x8xbf16>, vector<8x8xf32> -> vector<8x8xf32>
    %cst_18 = arith.constant dense<0.000000e+00> : vector<8x8xf32>
    %13 = tpu.matmul %1, %5, %cst_18 {dimension_numbers = #tpu.dot_dimension_numbers<[1], [0], [0], [1], [0, 0, 1, 1], [], []>} : vector<8x32xbf16>, vector<32x8xbf16>, vector<8x8xf32> -> vector<8x8xf32>
    %cst_19 = arith.constant dense<0.000000e+00> : vector<8x8xf32>
    %14 = tpu.matmul %1, %7, %cst_19 {dimension_numbers = #tpu.dot_dimension_numbers<[1], [0], [0], [1], [0, 0, 1, 1], [], []>} : vector<8x32xbf16>, vector<32x8xbf16>, vector<8x8xf32> -> vector<8x8xf32>
    %15 = arith.mulf %12, %10 : vector<8x8xf32>
    %c4_i32 = arith.constant 4 : i32
    %16 = tpu.dynamic_rotate %12 by %c4_i32 dim 1 : vector<8x8xf32>, i32 -> vector<8x8xf32>
    %17 = arith.mulf %16, %11 : vector<8x8xf32>
    %18 = arith.addf %15, %17 : vector<8x8xf32>
    %19 = arith.mulf %13, %10 : vector<8x8xf32>
    %c4_i32_20 = arith.constant 4 : i32
    %20 = tpu.dynamic_rotate %13 by %c4_i32_20 dim 1 : vector<8x8xf32>, i32 -> vector<8x8xf32>
    %21 = arith.mulf %20, %11 : vector<8x8xf32>
    %22 = arith.addf %19, %21 : vector<8x8xf32>
    %cst_21 = arith.constant 0.353553385 : f32
    %23 = vector.broadcast %cst_21 : f32 to vector<8x8xf32>
    %24 = arith.mulf %18, %23 : vector<8x8xf32>
    %25 = arith.truncf %24 : vector<8x8xf32> to vector<8x8xbf16>
    %26 = arith.truncf %22 : vector<8x8xf32> to vector<8x8xbf16>
    %cst_22 = arith.constant dense<0.000000e+00> : vector<8x8xf32>
    %27 = tpu.matmul %25, %26, %cst_22 {dimension_numbers = #tpu.dot_dimension_numbers<[1], [1], [0], [0], [0, 0, 1, 0], [], []>} : vector<8x8xbf16>, vector<8x8xbf16>, vector<8x8xf32> -> vector<8x8xf32>
    %28 = tpu.iota {dimensions = array<i32: 0>} : vector<8x8xi32>
    %29 = tpu.iota {dimensions = array<i32: 1>} : vector<8x8xi32>
    %30 = arith.cmpi sgt, %29, %28 : vector<8x8xi32>
    %cst_23 = arith.constant -1.000000e+09 : f32
    %cst_24 = arith.constant 0.000000e+00 : f32
    %31 = vector.broadcast %cst_23 : f32 to vector<8x8xf32>
    %32 = vector.broadcast %cst_24 : f32 to vector<8x8xf32>
    %33 = arith.select %30, %31, %32 : vector<8x8xi1>, vector<8x8xf32>
    %34 = arith.addf %27, %33 : vector<8x8xf32>
    %cst_25 = arith.constant dense<0xFF800000> : vector<8xf32>
    %35 = vector.multi_reduction <maximumf>, %34, %cst_25 [1] : vector<8x8xf32> to vector<8xf32>
    %36 = vector.shape_cast %35 : vector<8xf32> to vector<8x1xf32>
    %37 = vector.broadcast %36 : vector<8x1xf32> to vector<8x8xf32>
    %38 = arith.subf %34, %37 : vector<8x8xf32>
    %39 = math.exp %38 : vector<8x8xf32>
    %cst_26 = arith.constant dense<0.000000e+00> : vector<8xf32>
    %40 = vector.multi_reduction <add>, %39, %cst_26 [1] : vector<8x8xf32> to vector<8xf32>
    %41 = vector.shape_cast %40 : vector<8xf32> to vector<8x1xf32>
    %42 = tpu.reciprocal %41 {approx = true} : vector<8x1xf32> -> vector<8x1xf32>
    %43 = vector.broadcast %42 : vector<8x1xf32> to vector<8x8xf32>
    %44 = arith.mulf %39, %43 : vector<8x8xf32>
    %45 = arith.truncf %44 : vector<8x8xf32> to vector<8x8xbf16>
    %46 = arith.truncf %14 : vector<8x8xf32> to vector<8x8xbf16>
    %cst_27 = arith.constant dense<0.000000e+00> : vector<8x8xf32>
    %47 = tpu.matmul %45, %46, %cst_27 {dimension_numbers = #tpu.dot_dimension_numbers<[1], [0], [0], [1], [0, 0, 1, 1], [], []>} : vector<8x8xbf16>, vector<8x8xbf16>, vector<8x8xf32> -> vector<8x8xf32>
    %48 = arith.truncf %47 : vector<8x8xf32> to vector<8x8xbf16>
    %cst_28 = arith.constant dense<0.000000e+00> : vector<8x32xf32>
    %49 = tpu.matmul %48, %9, %cst_28 {dimension_numbers = #tpu.dot_dimension_numbers<[1], [0], [0], [1], [0, 0, 1, 1], [], []>} : vector<8x8xbf16>, vector<8x32xbf16>, vector<8x32xf32> -> vector<8x32xf32>
    %c0_i32 = arith.constant 0 : i32
    %50 = arith.cmpi eq, %arg1, %c0_i32 : i32
    %51 = arith.extui %50 : i1 to i32
    %c0_i32_29 = arith.constant 0 : i32
    %52 = arith.cmpi ne, %51, %c0_i32_29 : i32
    scf.if %52 {
      %cst_36 = arith.constant 0.000000e+00 : f32
      %59 = vector.broadcast %cst_36 : f32 to vector<1x8x32xf32>
      %c0_37 = arith.constant 0 : index
      %c0_38 = arith.constant 0 : index
      %c0_39 = arith.constant 0 : index
      %60 = vector.load %arg9[%c0_37, %c0_38, %c0_39] : memref<1x8x32xf32, #tpu.memory_space<vmem>>, vector<1x8x32xf32>
      tpu.vector_store %arg9[%c0_37, %c0_38, %c0_39], %59 {strides = array<i32>} : memref<1x8x32xf32, #tpu.memory_space<vmem>>, vector<1x8x32xf32>,
    } else {
    }
    %c0_30 = arith.constant 0 : index
    %c0_31 = arith.constant 0 : index
    %c0_32 = arith.constant 0 : index
    %53 = vector.load %arg9[%c0_30, %c0_31, %c0_32] : memref<1x8x32xf32, #tpu.memory_space<vmem>>, vector<1x8x32xf32>
    %54 = vector.shape_cast %53 : vector<1x8x32xf32> to vector<8x32xf32>
    %55 = arith.addf %54, %49 : vector<8x32xf32>
    %c0_33 = arith.constant 0 : index
    %c0_34 = arith.constant 0 : index
    %c0_35 = arith.constant 0 : index
    %56 = vector.load %arg9[%c0_33, %c0_34, %c0_35] : memref<1x8x32xf32, #tpu.memory_space<vmem>>, vector<1x8x32xf32>
    %57 = vector.shape_cast %56 : vector<1x8x32xf32> to vector<8x32xf32>
    %58 = vector.shape_cast %55 : vector<8x32xf32> to vector<1x8x32xf32>
    tpu.vector_store %arg9[%c0_33, %c0_34, %c0_35], %58 {strides = array<i32>} : memref<1x8x32xf32, #tpu.memory_space<vmem>>, vector<1x8x32xf32>,
    return
  }
  func.func @transform_0(%arg0: i32, %arg1: i32) -> (i32, i32, i32) {
    %c0_i32 = arith.constant 0 : i32
    %c0_i32_0 = arith.constant 0 : i32
    %c0_i32_1 = arith.constant 0 : i32
    return %arg0, %c0_i32, %c0_i32_0 : i32, i32, i32
  }
  func.func @transform_1(%arg0: i32, %arg1: i32) -> (i32, i32, i32) {
    %c0_i32 = arith.constant 0 : i32
    %c0_i32_0 = arith.constant 0 : i32
    %c0_i32_1 = arith.constant 0 : i32
    return %arg1, %c0_i32, %c0_i32_0 : i32, i32, i32
  }
  func.func @transform_2(%arg0: i32, %arg1: i32) -> (i32, i32, i32) {
    %c0_i32 = arith.constant 0 : i32
    %c0_i32_0 = arith.constant 0 : i32
    %c0_i32_1 = arith.constant 0 : i32
    return %arg1, %c0_i32, %c0_i32_0 : i32, i32, i32
  }
  func.func @transform_3(%arg0: i32, %arg1: i32) -> (i32, i32, i32) {
    %c0_i32 = arith.constant 0 : i32
    %c0_i32_0 = arith.constant 0 : i32
    %c0_i32_1 = arith.constant 0 : i32
    return %arg1, %c0_i32, %c0_i32_0 : i32, i32, i32
  }
  func.func @transform_4(%arg0: i32, %arg1: i32) -> (i32, i32, i32) {
    %c0_i32 = arith.constant 0 : i32
    %c0_i32_0 = arith.constant 0 : i32
    %c0_i32_1 = arith.constant 0 : i32
    return %arg1, %c0_i32, %c0_i32_0 : i32, i32, i32
  }
  func.func @transform_5(%arg0: i32, %arg1: i32) -> (i32, i32) {
    %c0_i32 = arith.constant 0 : i32
    %c0_i32_0 = arith.constant 0 : i32
    %c0_i32_1 = arith.constant 0 : i32
    return %c0_i32, %c0_i32_0 : i32, i32
  }
  func.func @transform_6(%arg0: i32, %arg1: i32) -> (i32, i32) {
    %c0_i32 = arith.constant 0 : i32
    %c0_i32_0 = arith.constant 0 : i32
    %c0_i32_1 = arith.constant 0 : i32
    return %c0_i32, %c0_i32_0 : i32, i32
  }
  func.func @transform_7(%arg0: i32, %arg1: i32) -> (i32, i32, i32) {
    %c0_i32 = arith.constant 0 : i32
    %c0_i32_0 = arith.constant 0 : i32
    %c0_i32_1 = arith.constant 0 : i32
    return %arg0, %c0_i32, %c0_i32_0 : i32, i32, i32
  }
}

</mosaic_0001>

<bundles_post_ra>
// kernel: tpu_custom_call.1
= control target key start
LH: loop header
LB: loop body
LE: loop exit
PB: predicated region body
PF: predicated region fallthrough
CT: control target
= control target key end

     0   :  { %12 = vsyncpa [#allocation3], 0  ;;  %s1387_s0 = inlined_call_operand.vmem [shape: bf16[2,8,32], index: 0, kind: input, shape index: {}]   ;;  %s1388_s1 = inlined_call_operand.vmem [shape: bf16[4,32,8], index: 1, kind: input, shape index: {}]   ;;  %s1389_s2 = inlined_call_operand.vmem [shape: bf16[4,32,8], index: 2, kind: input, shape index: {}]   ;;  %s1390_s3 = inlined_call_operand.vmem [shape: bf16[4,32,8], index: 3, kind: input, shape index: {}]   ;;  %s1391_s4 = inlined_call_operand.vmem [shape: bf16[4,8,32], index: 4, kind: input, shape index: {}]   ;;  %s1392_s5 = inlined_call_operand.vmem [shape: f32[8,8], index: 5, kind: input, shape index: {}]   ;;  %s1393_s6 = inlined_call_operand.vmem [shape: f32[8,8], index: 6, kind: input, shape index: {}]   ;;  %s1394_s7 = inlined_call_operand.hbm [shape: f32[2,8,32], index: 7, kind: output, shape index: {}]  }
   0x1   :  { %14 = vsyncpa [#allocation3 + $0x1], 0  ;;  %s1193_s24 = smov 0   ;;  %s1195_s25 = smov 0  }
   0x2   :  { %s1197_s26 = smov 0   ;;  %s1199_s27 = smov 0  }
   0x3   :  { %s1201_s28 = smov 0   ;;  %s1203_s29 = smov 0  }
   0x4   :  { %s1205_s30 = smov 0   ;;  %s1207_s8 = smov 0  }
   0x5 LB: > { %1399 = sst [smem:[#allocation5_spill]] %s1136_s29  ;;  %s874_s9 = sadd.s32 4294967295, %s1144_s8   ;;  %s1144_s8 = sphi %s1207_s8, %s20_s8   ;;  %s1140_s30 = sphi %s1205_s30, %s1409_s30   ;;  %s1136_s29 = sphi %s1203_s29, %s1408_s29   ;;  %s1132_s28 = sphi %s1201_s28, %s1407_s28   ;;  %s1128_s27 = sphi %s1199_s27, %s1406_s27   ;;  %s1124_s26 = sphi %s1197_s26, %s1412_s26   ;;  %s1120_s25 = sphi %s1195_s25, %s1411_s25   ;;  %s1116_s24 = sphi %s1193_s24, %s1410_s24  }
   0x6   : > { %1400 = sst [smem:[#allocation6_spill]] %s1140_s30  ;;  %s875_s10 = sadd.s32 4294967294, %s1144_s8  }
   0x7   : > { %s29_s11 = sadd.s32 1, %s1136_s29  ;;  %s32_s12 = sadd.s32 1, %s1140_s30 }
   0x8   : > { %p30_p0 = scmp.ge.s32.totalorder %s29_s11, 4  ;;  %p221_p1 = scmp.ne.s32.totalorder %s1124_s26, %s1120_s25 }
   0x9   : > { %p222_p2 = scmp.eq.s32.totalorder %s874_s9, 7  ;;  %p227_p4 = scmp.ne.s32.totalorder %s1120_s25, %s1116_s24 }
   0xa   : > { %s1414_s11 = smov (%p30_p0, %s29_s11), 0  ;;  %s1416_s12 = smov (!%p30_p0, %s32_s12), %s1140_s30 }
   0xb   : > { %1401 = sst [smem:[#allocation7_spill]] %s1414_s11  ;;  %p1242_p3 = por %p222_p2, %p221_p1 }
   0xc   : > { %p34_p5 = scmp.ge.s32.totalorder %s1416_s12, 2  ;;  %p228_p6 = scmp.eq.s32.totalorder %s875_s10, 7 }
   0xd   : > { %p878_p7 = scmp.ge.s32.totalorder %s1144_s8, 1  ;;  %p290_p8 = scmp.lt.s32.totalorder %s1144_s8, 9 }
   0xe   : > { %s1418_s12 = smov (%p34_p5, %s1416_s12), 0  ;;  %p1252_p9 = por %p228_p6, %p227_p4 }
   0xf   : > { %1403 = sst [smem:[#allocation8_spill]] %s1418_s12  ;;  %p291_p10 = pnand %p878_p7, %p290_p8 }
  0x10   : > { %s208_s15 = ssub.s32 %s1140_s30, %s1418_s12  ;;  %s211_s16 = sadd.s32 1, %s1124_s26 }
  0x11   : > { %p209_p11 = scmp.eq.s32.totalorder %s208_s15, 0  ;;  %294 = sbr.rel (%p291_p10) target bundleno = 1520 (0x5f0), region = 48 }
  0x12   : > { %p344_p12 = scmp.lt.s32.totalorder (!%p291_p10), %s1128_s27, 3  ;;  %s1395_s18 = sand.u32 (!%p291_p10), 1, %s1120_s25  }
  0x13   : > { %s1260_s17 = scalar_select %p209_p11, %s1124_s26, %s211_s16  }
  0x14   : > { %s1267_s19 = sshll.u32 (!%p291_p10), %s1395_s18, 3  ;;  %p340_p13 = scmp.lt.s32.totalorder (!%p291_p10), %s1132_s28, 1 }
  0x15   : > { %p900_p0 = scmp.ne.s32.totalorder (!%p291_p10), %s1128_s27, 0 }
  0x16   : > { %v1146_v0 = vmov 0.0   ;;  %s1271_s20 = scalar_select %p344_p12, %s1128_s27, 3  ;;  %vm1147_vm0 = vmmov 0   ;;  %vm392_vm1 = vcmask 261120   ;;  %vm541_vm2 = vcmask 1047616   ;;  %v379_v16 = vld [vmem:[%s1393_s6] sm:$0xff] }
  0x17   : > { %931 = vmatprep.subr.bf16.mxu1 %v1146_v0  ;;  %923 = vmatprep.subr.bf16.mxu0 %v1146_v0  ;;  %s341_s18 = scalar_select %p340_p13, %s1132_s28, 1  ;;  %v378_v26 = vld [vmem:[%s1392_s5] sm:$0xff]  ;;  %vm580_vm3 = vcmask 64512   ;;  %v574_v39 = vlaneseq  ;;  %vm643_vm5 = vcmask 1043456  }
  0x18   : > { %935 = vmatprep.mubr.msk.bf16.mxu1 %vm1147_vm0, %v1146_v0  ;;  %927 = vmatprep.mubr.msk.bf16.mxu0 %vm1147_vm0, %v1146_v0  ;;  %s905_s21 = sshll.u32 %s1271_s20, 4 }
  0x19   : > { %s353_s9 = scalar_lea.vmem %s1389_s2, %s905_s21  ;;  %s348_s16 = scalar_lea.vmem %s1388_s1, %s905_s21  ;;  %v575_v40 = vshrl.u32 %v574_v39, 7  ;;  %v577_v41 = vand.u32 127, %v574_v39 }
  0x1a   : > { %v1042_v1 = vld [vmem:[%s353_s9 + $0x8] sm:$0xff]   ;;  %v1044_v3 = vld [vmem:[%s353_s9] sm:$0xff]   ;;  %s1289_s30 = scalar_lea.vmem %s1390_s3, %s905_s21  ;;  %s880_s29 = sshll.u32 %s341_s18, 2 }
  0x1b   : > { %v1043_v2 = vld [vmem:[%s348_s16 + $0x8] sm:$0xff]   ;;  %932 = vmatpush3.bf16.msra.mxu1 %v1042_v1  ;;  %v1045_v4 = vld [vmem:[%s348_s16] sm:$0xff]   ;;  %s343_s10 = scalar_lea.vmem %s1387_s0, %s880_s29  ;;  %s1148_s29 = smov 8   ;;  %vm578_vm4 = vcmp.gt.s32.totalorder %v577_v41, %v575_v40 }
  0x1c   : > { %933 = vmatprep.subr.bf16.mxu1 %v1146_v0  ;;  %924 = vmatpush3.bf16.msra.mxu0 %v1043_v2  ;;  %v364_v5 = vld [vmem:[%s343_s10] sm:$0xf]  ;;  %s1149_s18 = smov 4   ;;  %s1150_s21 = smov 124   ;;  %v1046_v37 = vld [vmem:[%s1289_s30 + $0x8] sm:$0xff]  }
  0x1d   : > { %925 = vmatprep.subr.bf16.mxu0 %v1146_v0  ;;  %v1047_v38 = vld [vmem:[%s1289_s30] sm:$0xff]   ;;  %v579_v42 = vsel %vm578_vm4, -1e+09, %v1146_v0  ;;  %s887_s30 = sshll.u32 %s1271_s20, 2  ;;  %s339_s20 = scalar_lea.vmem [#allocation2], %s1267_s19 }
  0x1e   : > { %s362_s23 = scalar_lea.vmem %s1391_s4, %s887_s30 }
  0x1f   : > { %934 = vmatpush3.bf16.msra.mxu1 %v1044_v3  ;;  %v377_v60 = vld [vmem:[%s362_s23] sm:$0xf] }
  0x20   : > { %926 = vmatpush3.bf16.msra.mxu0 %v1045_v4  ;;  %947 = vmatprep.subr.bf16.mxu1 %v1146_v0  ;;  %v692_v61 = vsel %vm643_vm5, %v377_v60, 0 }
  0x21   : > { %939 = vmatprep.subr.bf16.mxu0 %v1146_v0 }
  0x22   : > { %936 = vmatmul.mubr.msk.bf16.vlgmr.msra.gmra.mxu1 %vm392_vm1, %v364_v5 }
  0x23   : > { %928 = vmatmul.mubr.msk.bf16.vlgmr.msra.gmra.mxu0 %vm392_vm1, %v364_v5  ;;  %949 = vmatprep.mubr.msk.bf16.mxu1 %vm1147_vm0, %v1146_v0 }
  0x24   : > { %943 = vmatprep.mubr.msk.bf16.mxu0 %vm1147_vm0, %v1146_v0  ;;  %940 = vmatpush3.bf16.msra.mxu0 %v1046_v37 }
  0x25   : > { %941 = vmatprep.subr.bf16.mxu0 %v1146_v0 }
  0x28   : > { %942 = vmatpush3.bf16.msra.mxu0 %v1047_v38 }
  0x29   : > { %953 = vmatprep.subr.bf16.mxu0 %v1146_v0 }
  0x2b   : > { %944 = vmatmul.mubr.msk.bf16.vlgmr.msra.gmra.mxu0 %vm392_vm1, %v364_v5 }
  0x2c   : > { %955 = vmatprep.mubr.msk.bf16.mxu0 %vm1147_vm0, %v1146_v0 }
  0xe2   : > { %v482_v6 = vpop.f32.mrf.mxu1 }
  0xe3   : > { %559 = vrot.lane.b32.xlu0 %v482_v6, %s1148_s29  ;;  %v430_v7 = vpop.f32.mrf.mxu0  ;;  %v558_v27 = vmul.f32 %v482_v6, %v378_v26 }
  0xe4   : > { %v937_v8 = vpop.f32.mrf.mxu1  ;;  %v540_v31 = vmul.f32 %v430_v7, %v378_v26 }
  0xe5   : > { %v929_v9 = vpop.f32.mrf.mxu0 }
  0xe6   : > { %v485_v10 = vpop.f32.mrf.mxu1 }
  0xe7   : > { %542 = vrot.lane.b32.xlu0 %v430_v7, %s1148_s29  ;;  %v433_v11 = vpop.f32.mrf.mxu0 }
  0xe8   : > { %v938_v12 = vpop.f32.mrf.mxu1 }
  0xe9   : > { %v930_v13 = vpop.f32.mrf.mxu0 }
  0xeb   : > { %v534_v54 = vpop.f32.mrf.mxu0 }
  0xec   : > { %v639_v55 = vpack.c.bf16 %v534_v54, %v534_v54 }
  0xed   : > { %v945_v56 = vpop.f32.mrf.mxu0 }
  0xee   : > { %v645_v57 = vsel %vm643_vm5, %v639_v55, 0 }
  0xef   : > { %v537_v58 = vpop.f32.mrf.mxu0  ;;  %954 = vmatpush3.bf16.msra.mxu0 %v645_v57 }
  0xf1   : > { %v946_v59 = vpop.f32.mrf.mxu0 }
 0x155   : > { %v560_v14 = vpop.permute.xlu0 %559 }
 0x156   : > { %v561_v15 = vsel %vm541_vm2, %v560_v14, %v482_v6 }
 0x157   : > { %562 = vrot.lane.b32.xlu1 %v561_v15, %s1148_s29 }
 0x159   : > { %v543_v17 = vpop.permute.xlu0 %542 }
 0x15a   : > { %v544_v18 = vsel %vm541_vm2, %v543_v17, %v430_v7 }
 0x15b   : > { %549 = vrot.lane.b32.xlu1 %v379_v16, %s1149_s18  ;;  %545 = vrot.lane.b32.xlu0 %v544_v18, %s1148_s29 }
 0x1c9   : > { %v563_v19 = vpop.permute.xlu1 %562 }
 0x1ca   : > { %v564_v20 = vsel %vm541_vm2, %v563_v19, %v482_v6 }
 0x1cd   : > { %v550_v21 = vpop.permute.xlu1 %549  ;;  %v546_v22 = vpop.permute.xlu0 %545 }
 0x1ce   : > { %v565_v23 = vmul.f32 %v564_v20, %v550_v21  ;;  %v547_v24 = vsel %vm541_vm2, %v546_v22, %v430_v7 }
 0x1cf   : > { %v552_v25 = vmul.f32 %v550_v21, %v547_v24 }
 0x1d0   : > { %567 = vrot.lane.b32.xlu1 %v565_v23, %s1150_s21 }
 0x1d1   : > { %554 = vrot.lane.b32.xlu0 %v552_v25, %s1150_s21 }
 0x242   : > { %v568_v28 = vpop.permute.xlu1 %567 }
 0x243   : > { %v570_v29 = vadd.f32 %v568_v28, %v558_v27  ;;  %v555_v30 = vpop.permute.xlu0 %554 }
 0x244   : > { %v557_v33 = vadd.f32 %v555_v30, %v540_v31 }
 0x245   : > { %v573_v32 = vpack.c.bf16 %v570_v29, %v570_v29 }
 0x246   : > { %v571_v35 = vmul.f32 0.35355338, %v557_v33 }
 0x247   : > { %v585_v34 = vsel %vm580_vm3, %v573_v32, 0 }
 0x248   : > { %948 = vmatpush3.bf16.xpose.msra.mxu1 %v585_v34  ;;  %v572_v36 = vpack.c.bf16 %v571_v35, %v571_v35 }
 0x249   : > { %959 = vmatprep.subr.bf16.mxu1 %v1146_v0 }
 0x24f   : > { %950 = vmatmul.mubr.msk.bf16.vlgmr.msra.gmra.mxu1 %vm580_vm3, %v572_v36 }
 0x250   : > { %961 = vmatprep.mubr.msk.bf16.mxu1 %vm1147_vm0, %v1146_v0  ;;  %960 = vmatpush3.bf16.msra.mxu1 %v692_v61 }
 0x30f   : > { %v621_v43 = vpop.f32.mrf.mxu1 }
 0x310   : > { %v622_v44 = vadd.f32 %v621_v43, %v579_v42 }
 0x311   : > { %v951_v45 = vpop.f32.mrf.mxu1 }
 0x312   : > { %v627_v46 = vsel %vm580_vm3, %v622_v44, -inf }
 0x313   : > { %628 = vmax.xlane.f32.xlu1 %v627_v46  ;;  %v624_v47 = vpop.f32.mrf.mxu1 }
 0x315   : > { %v952_v48 = vpop.f32.mrf.mxu1 }
 0x39c   : > { %v629_v49 = vpop.xlane.xlu1 %628 }
 0x39d   : > { %v630_v50 = vsub.f32 %v622_v44, %v629_v49 }
 0x39f   : > { %v631_v51 = vmul.f32 1.442695, %v630_v50 }
 0x3a1   : > { %1048 = vpow2.f32 %v631_v51 }
 0x3ae   : > { %v1049_v52 = vpop.eup %1048 }
 0x3af   : > { %v633_v53 = vsel %vm580_vm3, %v1049_v52, 0.0 }
 0x3b0   : > { %634 = vadd.xlane.f32.xlu0 %v633_v53 }
 0x439   : > { %v635_v62 = vpop.xlane.xlu0 %634 }
 0x43a   : > { %1050 = vrcp.f32 %v635_v62 }
 0x447   : > { %v1051_v63 = vpop.eup %1050 }
 0x448   : > { %v637_v0 = vmul.f32 %v1051_v63, %v1049_v52 }
 0x44a   : > { %v638_v1 = vpack.c.bf16 %v637_v0, %v637_v0 }
 0x44c   : > { %956 = vmatmul.mubr.msk.bf16.vlgmr.msra.gmra.mxu0 %vm580_vm3, %v638_v1 }
 0x50c   : > { %v681_v2 = vpop.f32.mrf.mxu0 }
 0x50d   : > { %v687_v3 = vpack.c.bf16 %v681_v2, %v681_v2 }
 0x50e   : > { %v957_v4 = vpop.f32.mrf.mxu0 }
 0x50f   : > { %962 = vmatmul.mubr.msk.bf16.vlgmr.msra.gmra.mxu1 %vm580_vm3, %v687_v3 }
 0x510   : > { %v684_v5 = vpop.f32.mrf.mxu0 }
 0x512   : > { %v958_v6 = vpop.f32.mrf.mxu0 }
 0x5cf   : > { %v728_v7 = vpop.f32.mrf.mxu1 }
 0x5d1   : > { %v963_v8 = vpop.f32.mrf.mxu1  ;;  %737 = sbr.rel (%p900_p0) target bundleno = 1496 (0x5d8), region = 52 }
 0x5d3   : > { %v731_v9 = vpop.f32.mrf.mxu1 }
 0x5d5   : > { %v964_v10 = vpop.f32.mrf.mxu1 }
 0x5d6   : > { %v1151_v11 = vmov 0.0  }
 0x5d7   : > { %738 = vst.msk [vmem:[%s339_s20] sm:$0xff] %vm392_vm1, %v1151_v11 }
 0x5d8 PF: > { %s902_s10 = sshll.u32 %s1132_s28, 7  ;;  %s756_s18 = sshll.u32 %s339_s20, 4  ;;  %s757_s18 = int_to_ptr.vmem [resolvable:$true] %s756_s18 }
 0x5d9   : > { %s1338_s12 = scalar_lea.hbm %s1394_s7, %s902_s10  ;;  %s1405_s27 = sand.u32 1, %s1120_s25  }
 0x5da   : > { %s743_s19 = scalar_lea.sflag [#allocation3], %s1405_s27  ;;  %s1052_s21 = scalar_lea.vmem %s757_s18, 128 }
 0x5db   : > { %p1053_p1 = scmp.ne.s32.totalorder %s757_s18, %s1052_s21  ;;  %s1152_s9 = smov [#allocation2]  }
 0x5dc   : > { %s1056_s15 = sshll.u32 %s1152_s9, 4  ;;  %s1057_s15 = int_to_ptr.vmem [resolvable:$false] %s1056_s15 }
 0x5dd   : > { %p1054_p2 = pnand %p1053_p1, %p1242_p3  ;;  %s1058_s28 = scalar_lea.vmem %s1057_s15, 256 }
 0x5de   : > { %v739_v12 = vld [vmem:[%s339_s20] sm:$0xff]  ;;  %p1059_p5 = scmp.lt.s32.totalorder %s757_s18, %s1057_s15  ;;  %p1060_p6 = scmp.lt.s32.totalorder %s1058_s28, %s1052_s21 }
 0x5df   : > { %v740_v13 = vadd.f32 %v739_v12, %v728_v7  ;;  %p1055_p4 = pneg %p1054_p2 }
 0x5e0   : > { %p1061_p7 = por %p1060_p6, %p1059_p5 }
 0x5e1   : > { %741 = vst.msk [vmem:[%s339_s20] sm:$0xff] %vm392_vm1, %v740_v13 }
 0x5e2   : > { %p1062_p8 = pnand %p1061_p7, %p1055_p4 }
 0x5e4   : > { %1065 = shalt.err (!%p1062_p8)
}
 0x5e5   : > { %s1066_s30 = scalar_lea.hbm %s1338_s12, 128  ;;  %s1070_s23 = scalar_lea.hbm %s1394_s7, 256 }
 0x5e6   : > { %p1067_p10 = scmp.ne.s32.totalorder %s1338_s12, %s1066_s30  ;;  %p1071_p13 = scmp.lt.s32.totalorder %s1338_s12, %s1394_s7 }
 0x5e7   : > { %p1072_p0 = scmp.lt.s32.totalorder %s1070_s23, %s1066_s30 }
 0x5e8   : > { %p1068_p11 = pnand %p1067_p10, %p1242_p3 }
 0x5e9   : > { %p1073_p1 = por %p1072_p0, %p1071_p13 }
 0x5ea   : > { %p1069_p12 = pneg %p1068_p11 }
 0x5ec   : > { %p1074_p2 = pnand %p1073_p1, %p1069_p12 }
 0x5ee   : > { %1077 = shalt.err (!%p1074_p2)
}
 0x5ef   : > { %965 = dma.vmem_to_hbm [thread:$0]  (%p1242_p3), %s757_s18, 128, %s1338_s12, %s743_s19  }
 0x5f0 PF: > { %p971_p4 = scmp.ge.s32.totalorder %s1144_s8, 2  ;;  %s768_s29 = sand.u32 1, %s1116_s24  }
 0x5f1   : > { %s769_s11 = scalar_lea.sflag [#allocation3], %s768_s29 }
 0x5f2   : > { %p968_p5 = pnand %p971_p4, %p1252_p9 }
 0x5f4   : > { %p969_p6 = pneg %p968_p5 }
 0x5f6   : > { %1111 = dma.done.wait (%p969_p6), %s769_s11, 128  }
 0x5f7   : > { %1113 = vsyncadd (%p969_p6), %s769_s11, 4294967168  ;;  %s20_s8 = sadd.s32 1, %s1144_s8   ;;  %s1406_s27 = sld [smem:[#allocation5_spill]] }
 0x5f8   : > { %p17_p7 = scmp.ge.s32.totalorder %s20_s8, 10   ;;  %s1407_s28 = sld [smem:[#allocation6_spill]] }
 0x5f9   : > { %s1408_s29 = sld [smem:[#allocation7_spill]]  ;;  %s1410_s24 = smov %s1120_s25 }
 0x5fa   : > { %s1409_s30 = sld [smem:[#allocation8_spill]]  ;;  %s1411_s25 = smov %s1124_s26 }
 0x5fb   : > { %s1412_s26 = smov %s1260_s17  ;;  %19 = sbr.rel (!%p17_p7) target bundleno = 5 (0x5), region = 99 }
 0x600   :  { %774 = vsyncpa [#allocation3], 1 }
 0x601   :  { %776 = vsyncpa [#allocation3 + $0x1], 1 }

</bundles_post_ra>
